<compile_context>
chip_gen: v7x
topology: tpu7x:2x2x1
jax: 0.10.0
libtpu: 0.0.40
codegen_flags: <defaults>
</compile_context>

<pallas_src>
import math
from functools import partial

import jax
import jax.numpy as jnp
from jax import lax
from jax.experimental import pallas as pl
from jax.experimental.pallas import tpu as pltpu

_EPS = 1e-5
_INV_SQRT2 = 1.0 / math.sqrt(2.0)
_VMEM_LIMIT = 32 * 1024 * 1024          # safe on v5e/v6e (128 MiB) and v7x (64 MiB)
_BLOCK_BUDGET = 16 * 1024 * 1024        # double-buffered per-step block bytes target


def _gelu_exact(v):
    # Exact erf GELU (PyTorch nn.GELU default). TODO(synk): tanh-approx GELU
    # would move the transcendental to the EUP slot if bit-parity is not needed.
    return 0.5 * v * (1.0 + lax.erf(v * _INV_SQRT2))


# ------------------------- Pallas kernels -------------------------

def _stats_kernel(x_ref, gram_ref, xsum_ref):
    """Accumulate G += x x^T and s += sum_L(x) over the whole (N, L) grid."""
    first = jnp.logical_and(pl.program_id(0) == 0, pl.program_id(1) == 0)

    @pl.when(first)
    def _():
        gram_ref[...] = jnp.zeros_like(gram_ref)
        xsum_ref[...] = jnp.zeros_like(xsum_ref)

    x = x_ref[0]                                              # (Cin, TILE_L)
    # Contract over L on both operands -> (Cin, Cin), f32 accumulation on MXU.
    gram_ref[...] += lax.dot_general(
        x, x, (((1,), (1,)), ((), ())), preferred_element_type=jnp.float32)
    xsum_ref[...] += jnp.sum(x.astype(jnp.float32), axis=-1, keepdims=True)


def _apply_kernel(x_ref, w_ref, b_ref, o_ref, *, add_identity):
    """Folded conv+BN matmul -> GELU  [+ identity residual]."""
    x = x_ref[0]                                              # (Cin, TILE_L)
    y = jnp.dot(w_ref[...], x, preferred_element_type=jnp.float32) + b_ref[...]
    y = _gelu_exact(y)
    if add_identity:                                          # Cin == Cout here
        y = y + x.astype(jnp.float32)
    o_ref[0] = y.astype(o_ref.dtype)


def _apply_proj_kernel(x_ref, w_ref, b_ref, o_ref, *, cout):
    """Fused main+skip folded matmul (2*Cout rows): GELU(top) + bottom."""
    x = x_ref[0]                                              # (Cin, TILE_L)
    z = jnp.dot(w_ref[...], x, preferred_element_type=jnp.float32) + b_ref[...]
    y = _gelu_exact(z[:cout])
    s = z[cout:]
    o_ref[0] = (y + s).astype(o_ref.dtype)


# ------------------------- BN folding (tiny, plain JAX) -------------------------

def _fold_bn(w, b, gamma, beta, gram, xsum, count, eps):
    """Fold training-mode BatchNorm1d into conv weights using Gram-matrix stats.

    y = W x + b;  mean/var over all (N*L) positions follow from
    G = X X^T and s = X 1, so  W' = W * gamma*rsqrt(var),  b' = (b-mean)*scale+beta.
    """
    w = w.astype(jnp.float32)                                 # (Cout, Cin)
    b = b.astype(jnp.float32)[:, None]                        # (Cout, 1)
    gamma = gamma.astype(jnp.float32)[:, None]
    beta = beta.astype(jnp.float32)[:, None]

    ws = w @ xsum                                             # (Cout, 1)
    mean = (ws + count * b) / count
    sum_y2 = (jnp.sum((w @ gram) * w, axis=1, keepdims=True)
              + 2.0 * b * ws + count * b * b)
    var = jnp.maximum(sum_y2 / count - mean * mean, 0.0)      # biased variance
    scale = gamma * lax.rsqrt(var + eps)
    return w * scale, (b - mean) * scale + beta               # (Cout,Cin), (Cout,1)


# ------------------------- Wrapper -------------------------

def _pick_tile_l(L, cin, w_rows, x_itemsize):
    cands = [t for t in (2048, 1024, 512, 256, 128) if L % t == 0]
    for t in cands:
        if 2 * t * (cin * x_itemsize + w_rows * 4) <= _BLOCK_BUDGET:
            return t
    if cands:
        return cands[-1]
    # TODO(synk): pad L to a multiple of 128 when L is large with no aligned divisor.
    return L


def residual1x1_block(x_ncl, params, *, with_residual, matmul_dtype=jnp.float32):
    """x_ncl: (N, Cin, L); returns (N, Cout, L).

    matmul_dtype=jnp.bfloat16 halves HBM traffic / boosts MXU on v6e/v7x
    (f32 accumulation + f32 BN/GELU epilogue are kept either way).
    """
    N, Cin, L = x_ncl.shape
    Cout = params["conv_w"].shape[0]
    count = float(N * L)
    proj_skip = bool(with_residual) and (Cin != Cout)
    w_rows = 2 * Cout if proj_skip else Cout

    x = x_ncl.astype(matmul_dtype)
    x_itemsize = jnp.dtype(matmul_dtype).itemsize
    tile_l = _pick_tile_l(L, Cin, w_rows, x_itemsize)
    n_l = L // tile_l

    vmem = pl.BlockSpec(memory_space=pltpu.MemorySpace.VMEM)

    # ---- pass 1: global BN statistics (Gram matrix + column sums) ----
    gram, xsum = pl.pallas_call(
        _stats_kernel,
        grid=(N, n_l),
        in_specs=[pl.BlockSpec((1, Cin, tile_l), lambda n, l: (n, 0, l))],
        out_specs=(pl.BlockSpec((Cin, Cin), lambda n, l: (0, 0)),
                   pl.BlockSpec((Cin, 1), lambda n, l: (0, 0))),
        out_shape=(jax.ShapeDtypeStruct((Cin, Cin), jnp.float32),
                   jax.ShapeDtypeStruct((Cin, 1), jnp.float32)),
        compiler_params=pltpu.CompilerParams(
            dimension_semantics=("arbitrary", "arbitrary"),
            vmem_limit_bytes=_VMEM_LIMIT),
    )(x)

    # ---- fold BN (and skip-BN) into the 1x1-conv weights ----
    wf, bf = _fold_bn(params["conv_w"][:, :, 0], params["conv_b"],
                      params["bn_gamma"], params["bn_beta"],
                      gram, xsum, count, _EPS)
    if proj_skip:
        wsf, bsf = _fold_bn(params["skip_conv_w"][:, :, 0], params["skip_conv_b"],
                            params["skip_bn_gamma"], params["skip_bn_beta"],
                            gram, xsum, count, _EPS)
        w_all = jnp.concatenate([wf, wsf], axis=0)            # (2*Cout, Cin)
        b_all = jnp.concatenate([bf, bsf], axis=0)            # (2*Cout, 1)
        kernel = partial(_apply_proj_kernel, cout=Cout)
    else:
        w_all, b_all = wf, bf
        kernel = partial(_apply_kernel, add_identity=bool(with_residual))

    w_all = w_all.astype(matmul_dtype)                        # bias stays f32

    # ---- pass 2: folded matmul + GELU (+ residual), fully parallel grid ----
    out = pl.pallas_call(
        kernel,
        grid=(N, n_l),
        in_specs=[pl.BlockSpec((1, Cin, tile_l), lambda n, l: (n, 0, l)),
                  vmem, vmem],
        out_specs=pl.BlockSpec((1, Cout, tile_l), lambda n, l: (n, 0, l)),
        out_shape=jax.ShapeDtypeStruct((N, Cout, L), x_ncl.dtype),
        compiler_params=pltpu.CompilerParams(
            dimension_semantics=("parallel", "parallel"),
            vmem_limit_bytes=_VMEM_LIMIT),
    )(x, w_all, b_all)
    return out


# ------------- Pure-JAX reference (mirrors PyTorch training-mode forward) -------------

def _bn_train_ref(y, gamma, beta, eps):
    mean = jnp.mean(y, axis=0, keepdims=True)
    var = jnp.mean((y - mean) ** 2, axis=0, keepdims=True)
    return (y - mean) * lax.rsqrt(var + eps) * gamma + beta


def residual1x1_block_ref(x_ncl, params, *, with_residual):
    N, Cin, L = x_ncl.shape
    Cout = params["conv_w"].shape[0]
    x2 = jnp.transpose(x_ncl, (0, 2, 1)).reshape(N * L, Cin).astype(jnp.float32)
    y = x2 @ jnp.transpose(params["conv_w"][:, :, 0]) + params["conv_b"][None, :]
    y = _bn_train_ref(y, params["bn_gamma"][None, :], params["bn_beta"][None, :], _EPS)
    y = _gelu_exact(y)
    if with_residual:
        if Cin != Cout:
            s = x2 @ jnp.transpose(params["skip_conv_w"][:, :, 0]) + params["skip_conv_b"][None, :]
            s = _bn_train_ref(s, params["skip_bn_gamma"][None, :],
                              params["skip_bn_beta"][None, :], _EPS)
        else:
            s = x2
        y = y + s
    return jnp.transpose(y.reshape(N, L, Cout), (0, 2, 1))


# ------------------------- Deterministic parameter init -------------------------

def make_params(key, in_dim, out_dim, with_residual):
    ks = jax.random.split(key, 4)
    bound = 1.0 / math.sqrt(in_dim)       # PyTorch Conv1d default init range
    params = {
        "conv_w": jax.random.uniform(ks[0], (out_dim, in_dim, 1), jnp.float32, -bound, bound),
        "conv_b": jax.random.uniform(ks[1], (out_dim,), jnp.float32, -bound, bound),
        "bn_gamma": jnp.ones((out_dim,), jnp.float32),
        "bn_beta": jnp.zeros((out_dim,), jnp.float32),
    }
    if with_residual and in_dim != out_dim:
        params.update({
            "skip_conv_w": jax.random.uniform(ks[2], (out_dim, in_dim, 1), jnp.float32, -bound, bound),
            "skip_conv_b": jax.random.uniform(ks[3], (out_dim,), jnp.float32, -bound, bound),
            "skip_bn_gamma": jnp.ones((out_dim,), jnp.float32),
            "skip_bn_beta": jnp.zeros((out_dim,), jnp.float32),
        })
    return params


if __name__ == "__main__":
    key = jax.random.PRNGKey(0)
    k_x, k_p1, k_p2, k_p3 = jax.random.split(key, 4)

    N, Cin, Cout, L = 2, 4, 8, 16
    x = jax.random.normal(k_x, (N, Cin, L), jnp.float32)

    # Case 1: with_residual=True, in_dim != out_dim (fused projection skip path)
    p1 = make_params(k_p1, Cin, Cout, with_residual=True)
    out1 = jax.block_until_ready(residual1x1_block(x, p1, with_residual=True))
    ref1 = residual1x1_block_ref(x, p1, with_residual=True)
    assert out1.shape == (N, Cout, L)
    assert jnp.allclose(out1, ref1, atol=1e-3, rtol=1e-3)

    # Case 2: with_residual=False (plain conv -> bn -> gelu)
    p2 = make_params(k_p2, Cin, Cout, with_residual=False)
    out2 = jax.block_until_ready(residual1x1_block(x, p2, with_residual=False))
    ref2 = residual1x1_block_ref(x, p2, with_residual=False)
    assert out2.shape == (N, Cout, L)
    assert jnp.allclose(out2, ref2, atol=1e-3, rtol=1e-3)

    # Case 3: with_residual=True, in_dim == out_dim (identity skip)
    x3 = jax.random.normal(k_x, (N, Cout, L), jnp.float32)
    p3 = make_params(k_p3, Cout, Cout, with_residual=True)
    out3 = jax.block_until_ready(residual1x1_block(x3, p3, with_residual=True))
    ref3 = residual1x1_block_ref(x3, p3, with_residual=True)
    assert out3.shape == (N, Cout, L)
    assert jnp.allclose(out3, ref3, atol=1e-3, rtol=1e-3)

    # Case 4: bf16 MXU operands (v6e/v7x fast path), f32 accumulation/epilogue.
    out4 = jax.block_until_ready(
        residual1x1_block(x, p1, with_residual=True, matmul_dtype=jnp.bfloat16))
    assert out4.shape == (N, Cout, L)
    assert jnp.allclose(out4, ref1, atol=5e-2, rtol=5e-2)

    print("KERNEL_OK")
</pallas_src>

<mosaic_0001>
module attributes {stable_mosaic.version = 11 : i64} {
  func.func @_stats_kernel(%arg0: i32, %arg1: i32, %arg2: memref<1x4x16xf32, #tpu.memory_space<vmem>>, %arg3: memref<4x4xf32, #tpu.memory_space<vmem>>, %arg4: memref<4x1xf32, #tpu.memory_space<vmem>>) attributes {dimension_semantics = [#tpu.dimension_semantics<arbitrary>, #tpu.dimension_semantics<arbitrary>], iteration_bounds = array<i64: 2, 1>, scalar_prefetch = 0 : i64, scratch_operands = 0 : i64, tpu.core_type = #tpu.core_type<tc>, window_params = [{transform_indices = @transform_0, window_bounds = array<i64: 1, 4, 16>}, {pipeline_mode = #tpu.pipeline_mode<synchronous>, transform_indices = @transform_1, window_bounds = array<i64: 4, 4>}, {pipeline_mode = #tpu.pipeline_mode<synchronous>, transform_indices = @transform_2, window_bounds = array<i64: 4, 1>}]} {
    %c0_i32 = arith.constant 0 : i32
    %0 = arith.cmpi eq, %arg0, %c0_i32 : i32
    %c0_i32_0 = arith.constant 0 : i32
    %1 = arith.cmpi eq, %arg1, %c0_i32_0 : i32
    %2 = arith.andi %0, %1 : i1
    %3 = arith.extui %2 : i1 to i32
    %c0_i32_1 = arith.constant 0 : i32
    %4 = arith.cmpi ne, %3, %c0_i32_1 : i32
    scf.if %4 {
      %cst_13 = arith.constant 0.000000e+00 : f32
      %16 = vector.broadcast %cst_13 : f32 to vector<4x4xf32>
      %c0_14 = arith.constant 0 : index
      %c0_15 = arith.constant 0 : index
      %17 = vector.load %arg3[%c0_14, %c0_15] : memref<4x4xf32, #tpu.memory_space<vmem>>, vector<4x4xf32>
      tpu.vector_store %arg3[%c0_14, %c0_15], %16 {strides = array<i32>} : memref<4x4xf32, #tpu.memory_space<vmem>>, vector<4x4xf32>,
      %cst_16 = arith.constant 0.000000e+00 : f32
      %18 = vector.broadcast %cst_16 : f32 to vector<4x1xf32>
      %c0_17 = arith.constant 0 : index
      %c0_18 = arith.constant 0 : index
      %19 = vector.load %arg4[%c0_17, %c0_18] : memref<4x1xf32, #tpu.memory_space<vmem>>, vector<4x1xf32>
      tpu.vector_store %arg4[%c0_17, %c0_18], %18 {strides = array<i32>} : memref<4x1xf32, #tpu.memory_space<vmem>>, vector<4x1xf32>,
    } else {
    }
    %c0 = arith.constant 0 : index
    %c0_2 = arith.constant 0 : index
    %c0_3 = arith.constant 0 : index
    %5 = vector.load %arg2[%c0, %c0_2, %c0_3] : memref<1x4x16xf32, #tpu.memory_space<vmem>>, vector<1x4x16xf32>
    %6 = vector.shape_cast %5 : vector<1x4x16xf32> to vector<4x16xf32>
    %c0_4 = arith.constant 0 : index
    %c0_5 = arith.constant 0 : index
    %7 = vector.load %arg3[%c0_4, %c0_5] : memref<4x4xf32, #tpu.memory_space<vmem>>, vector<4x4xf32>
    %cst = arith.constant dense<0.000000e+00> : vector<4x4xf32>
    %8 = tpu.matmul %6, %6, %cst {dimension_numbers = #tpu.dot_dimension_numbers<[1], [1], [0], [0], [0, 0, 1, 0], [], []>} : vector<4x16xf32>, vector<4x16xf32>, vector<4x4xf32> -> vector<4x4xf32>
    %9 = arith.addf %7, %8 : vector<4x4xf32>
    %c0_6 = arith.constant 0 : index
    %c0_7 = arith.constant 0 : index
    %10 = vector.load %arg3[%c0_6, %c0_7] : memref<4x4xf32, #tpu.memory_space<vmem>>, vector<4x4xf32>
    tpu.vector_store %arg3[%c0_6, %c0_7], %9 {strides = array<i32>} : memref<4x4xf32, #tpu.memory_space<vmem>>, vector<4x4xf32>,
    %c0_8 = arith.constant 0 : index
    %c0_9 = arith.constant 0 : index
    %11 = vector.load %arg4[%c0_8, %c0_9] : memref<4x1xf32, #tpu.memory_space<vmem>>, vector<4x1xf32>
    %cst_10 = arith.constant dense<0.000000e+00> : vector<4xf32>
    %12 = vector.multi_reduction <add>, %6, %cst_10 [1] : vector<4x16xf32> to vector<4xf32>
    %13 = vector.shape_cast %12 : vector<4xf32> to vector<4x1xf32>
    %14 = arith.addf %11, %13 : vector<4x1xf32>
    %c0_11 = arith.constant 0 : index
    %c0_12 = arith.constant 0 : index
    %15 = vector.load %arg4[%c0_11, %c0_12] : memref<4x1xf32, #tpu.memory_space<vmem>>, vector<4x1xf32>
    tpu.vector_store %arg4[%c0_11, %c0_12], %14 {strides = array<i32>} : memref<4x1xf32, #tpu.memory_space<vmem>>, vector<4x1xf32>,
    return
  }
  func.func @transform_0(%arg0: i32, %arg1: i32) -> (i32, i32, i32) {
    %c0_i32 = arith.constant 0 : i32
    %c0_i32_0 = arith.constant 0 : i32
    return %arg0, %c0_i32, %arg1 : i32, i32, i32
  }
  func.func @transform_1(%arg0: i32, %arg1: i32) -> (i32, i32) {
    %c0_i32 = arith.constant 0 : i32
    %c0_i32_0 = arith.constant 0 : i32
    %c0_i32_1 = arith.constant 0 : i32
    return %c0_i32, %c0_i32_0 : i32, i32
  }
  func.func @transform_2(%arg0: i32, %arg1: i32) -> (i32, i32) {
    %c0_i32 = arith.constant 0 : i32
    %c0_i32_0 = arith.constant 0 : i32
    %c0_i32_1 = arith.constant 0 : i32
    return %c0_i32, %c0_i32_0 : i32, i32
  }
}

</mosaic_0001>

<bundles_post_ra>
// kernel: tpu_custom_call.1
= control target key start
LH: loop header
LB: loop body
LE: loop exit
PB: predicated region body
PF: predicated region fallthrough
CT: control target
= control target key end

     0   :  { %8 = vsyncpa [#allocation3], 0  ;;  %s709_s0 = inlined_call_operand.hbm [shape: f32[2,4,16], index: 0, kind: input, shape index: {}]   ;;  %s710_s1 = inlined_call_operand.hbm [shape: f32[4,4], index: 1, kind: output, shape index: {0}]   ;;  %s711_s2 = inlined_call_operand.vmem [shape: f32[4,1], index: 2, kind: output, shape index: {1}]  }
   0x1   :  { %10 = vsyncpa [#allocation3 + $0x1], 0 }
   0x2   :  { %11 = vsyncpa [#allocation4], 0  ;;  %s549_s9 = smov 0   ;;  %s551_s10 = smov 0  }
   0x3   :  { %s553_s11 = smov 0   ;;  %s555_s12 = smov 0  }
   0x4   :  { %s557_s13 = smov 0   ;;  %s559_s14 = smov 0  }
   0x5 LB: > { %s330_s15 = sadd.s32 4294967295, %s527_s14   ;;  %s29_s16 = sadd.s32 1, %s523_s13  ;;  %s527_s14 = sphi %s559_s14, %s17_s14   ;;  %s523_s13 = sphi %s557_s13, %s722_s13   ;;  %s519_s12 = sphi %s555_s12, %s721_s12   ;;  %s515_s11 = sphi %s553_s11, %s720_s11   ;;  %s511_s10 = sphi %s551_s10, %s719_s10   ;;  %s507_s9 = sphi %s549_s9, %s718_s9  }
   0x6   : > { %p31_p0 = scmp.ge.s32.totalorder %s29_s16, 2  ;;  %s38_s17 = sadd.s32 1, %s515_s11 }
   0x7   : > { %p45_p1 = scmp.ne.s32.totalorder %s515_s11, %s511_s10  ;;  %p46_p2 = scmp.eq.s32.totalorder %s527_s14, 0 }
   0x8   : > { %s724_s16 = smov (%p31_p0, %s29_s16), 0  ;;  %p51_p4 = scmp.ne.s32.totalorder %s511_s10, %s507_s9 }
   0x9   : > { %p585_p3 = por %p46_p2, %p45_p1  ;;  %s33_s19 = ssub.s32 %s523_s13, %s724_s16 }
   0xa   : > { %p52_p5 = scmp.eq.s32.totalorder %s330_s15, 0  ;;  %p36_p6 = scmp.eq.s32.totalorder %s33_s19, 0 }
   0xb   : > { %p362_p8 = scmp.lt.s32.totalorder %s527_s14, 2  ;;  %s117_s22 = sand.u32 1, %s515_s11  }
   0xc   : > { %p594_p7 = por %p52_p5, %p51_p4  ;;  %s334_s23 = sshll.u32 %s523_s13, 6 }
   0xd   : > { %s600_s21 = scalar_select %p36_p6, %s515_s11, %s38_s17  }
   0xe   : > { %s333_s24 = sshll.u32 %s117_s22, 2  ;;  %s607_s27 = scalar_lea.hbm %s709_s0, %s334_s23 }
   0xf   : > { %s121_s28 = scalar_lea.vmem [#allocation2], %s333_s24  ;;  %p611_p9 = pnand %p362_p8, %p585_p3 }
  0x10   : > { %s129_s29 = sshll.u32 %s121_s28, 4  ;;  %s118_s3 = scalar_lea.sflag [#allocation3], %s117_s22  ;;  %s615_s29 = int_to_ptr.vmem [resolvable:$true] %s129_s29 }
  0x11   : > { %s417_s4 = scalar_lea.hbm %s607_s27, 64  ;;  %p419_p13 = pneg %p611_p9 }
  0x12   : > { %p418_p12 = scmp.ne.s32.totalorder %s607_s27, %s417_s4  ;;  %s422_s7 = scalar_lea.hbm %s709_s0, 128 }
  0x13   : > { %p423_p2 = scmp.lt.u32.totalorder %s607_s27, %s709_s0  ;;  %p424_p3 = scmp.lt.u32.totalorder %s422_s7, %s417_s4 }
  0x14   : > { %p420_p0 = pnand %p419_p13, %p418_p12  ;;  %p426_p5 = scmp.lt.u32.totalorder %s417_s4, %s607_s27 }
  0x15   : > { %p425_p4 = por %p424_p3, %p423_p2 }
  0x16   : > { %p421_p1 = pneg %p420_p0 }
  0x17   : > { %p427_p6 = por %p426_p5, %p425_p4 }
  0x19   : > { %p428_p8 = pnand %p427_p6, %p421_p1 }
  0x1b   : > { %431 = shalt.err (!%p428_p8)
}
  0x1c   : > { %s432_s17 = scalar_lea.vmem %s615_s29, 64  ;;  %s529_s18 = smov [#allocation2]  }
  0x1d   : > { %p433_p12 = scmp.ne.s32.totalorder %s615_s29, %s432_s17  ;;  %s437_s19 = sshll.u32 %s529_s18, 4  ;;  %s438_s19 = int_to_ptr.vmem [resolvable:$false] %s437_s19 }
  0x1e   : > { %s439_s22 = scalar_lea.vmem %s438_s19, 128  ;;  %p440_p11 = scmp.lt.s32.totalorder %s615_s29, %s438_s19 }
  0x1f   : > { %p435_p0 = pnand %p433_p12, %p419_p13  ;;  %p441_p2 = scmp.lt.s32.totalorder %s439_s22, %s432_s17 }
  0x21   : > { %p436_p10 = pneg %p435_p0  ;;  %p442_p3 = por %p441_p2, %p440_p11 }
  0x23   : > { %p443_p4 = pnand %p442_p3, %p436_p10 }
  0x25   : > { %446 = shalt.err (!%p443_p4)
}
  0x26   : > { %361 = dma.hbm_to_vmem [thread:$0]  (!%p611_p9), %s607_s27, 64, %s615_s29, %s118_s3  }
  0x27   : > { %p715_p1 = scmp.lt.s32.totalorder %s527_s14, 3  ;;  %p716_p5 = scmp.ge.s32.totalorder %s527_s14, 1 }
  0x29   : > { %p135_p13 = pnand %p716_p5, %p715_p1 }
  0x2a   : > { %s140_s23 = sand.u32 (!%p135_p13), 1, %s511_s10  }
  0x2b   : > { %138 = sbr.rel (%p135_p13) target bundleno = 294 (0x126), region = 24  ;;  %s336_s24 = sshll.u32 (!%p135_p13), %s140_s23, 2 }
  0x2c   : > { %s141_s25 = scalar_lea.sflag (!%p135_p13), [#allocation3], %s140_s23  ;;  %s144_s26 = scalar_lea.vmem (!%p135_p13), [#allocation2], %s336_s24 }
  0x32   : > { %498 = dma.done.wait (%p594_p7), %s141_s25, 64  }
  0x33   : > { %500 = vsyncadd (%p594_p7), %s141_s25, 4294967232  ;;  %p160_p10 = scmp.eq.s32.totalorder %s519_s12, 0 }
  0x34   : > { %vm166_vm0 = vcmask (%p160_p10), 27648   ;;  %vm168_vm1 = vcmask (%p160_p10), 3072   ;;  %v530_v0 = vmov (%p160_p10), 0.0  }
  0x35   : > { %165 = sbr.rel (!%p160_p10) target bundleno = 60 (0x3c), region = 32  ;;  %167 = vst.msk [vmem:[#allocation5] sm:$0xf] (%p160_p10), %vm166_vm0, %v530_v0 }
  0x36   : > { %169 = vst.msk [vmem:[%s711_s2] sm:$0xf] (%p160_p10), %vm168_vm1, %v530_v0 }
  0x3c PF: > { %v170_v1 = vld [vmem:[%s144_s26] sm:$0xf]  ;;  %vm172_vm2 = vcmask 130048   ;;  %vm250_vm3 = vcmask 125952   ;;  %v531_v2 = vmov 0.0   ;;  %vm532_vm4 = vmmov 0  }
  0x3d   : > { %347 = vmatprep.subr.mxu0 %v531_v2  ;;  %349 = vmatprep.mubr.msk.f32.mxu0 %vm532_vm4, %v531_v2  ;;  %v251_v3 = vsel %vm250_vm3, %v170_v1, 0.0  ;;  %v249_v4 = vld [vmem:[%s711_s2] sm:$0xf]  ;;  %vm255_vm5 = vcmask 3072   ;;  %v171_v7 = vld [vmem:[#allocation5] sm:$0xf] }
  0x3e   : > { %348 = vmatpush3.xpose.msk.msra.mxu0 %vm172_vm2, %v170_v1  ;;  %252 = vadd.xlane.f32.xlu0 %v251_v3  ;;  %s533_s3 = smov [#allocation5]   ;;  %vm247_vm6 = vcmask 27648   ;;  %p665_p7 = scmp.eq.s32.totalorder %s330_s15, 1 }
  0x3f   : > { %s264_s4 = sshll.u32 %s533_s3, 4  ;;  %s265_s4 = int_to_ptr.vmem [resolvable:$true] %s264_s4 }
  0x40   : > { %s447_s6 = scalar_lea.vmem %s265_s4, 64  ;;  %p454_p8 = scmp.lt.s32.totalorder %s265_s4, %s265_s4 }
  0x41   : > { %350 = vmatmul.mubr.msk.f32.vlgmr.msra.gmra.mrb[0].mxu0 %vm172_vm2, %v170_v1  ;;  %p448_p9 = scmp.ne.s32.totalorder %s265_s4, %s447_s6  ;;  %p455_p12 = scmp.lt.s32.totalorder %s447_s6, %s447_s6 }
  0x43   : > { %p449_p11 = pnand %p448_p9, %p665_p7  ;;  %p456_p0 = por %p455_p12, %p454_p8 }
  0x45   : > { %p450_p6 = pneg %p449_p11 }
  0x47   : > { %p457_p2 = pnand %p456_p0, %p450_p6 }
  0xcb   : > { %v253_v5 = vpop.xlane.xlu0 %252 }
  0xcc   : > { %v254_v6 = vadd.f32 %v253_v5, %v249_v4 }
  0xce   : > { %256 = vst.msk [vmem:[%s711_s2] sm:$0xf] %vm255_vm5, %v254_v6 }
 0x114   : > { %v242_v8 = vpop.f32.mrb[0].mxu0 }
 0x115   : > { %v246_v9 = vadd.f32 %v242_v8, %v171_v7  ;;  %v351_v10 = vpop.f32.mrb[1].mxu0 }
 0x117   : > { %248 = vst.msk [vmem:[#allocation5] sm:$0xf] %vm247_vm6, %v246_v9 }
 0x118   : > { %460 = shalt.err (!%p457_p2)
}
 0x119   : > { %s461_s8 = scalar_lea.hbm %s710_s1, 64 }
 0x11a   : > { %p462_p3 = scmp.ne.s32.totalorder %s710_s1, %s461_s8  ;;  %p467_p5 = scmp.lt.u32.totalorder %s461_s8, %s710_s1 }
 0x11c   : > { %p463_p4 = pnand %p462_p3, %p665_p7 }
 0x11e   : > { %p464_p1 = pneg %p463_p4 }
 0x120   : > { %p469_p13 = pnand %p467_p5, %p464_p1 }
 0x122   : > { %472 = shalt.err (!%p469_p13)
}
 0x123   : > { %355 = dma.vmem_to_hbm [thread:$0]  (%p665_p7), %s265_s4, 64, %s710_s1, [#allocation4]  }
 0x124   : > { %502 = dma.done.wait (%p665_p7), [#allocation4], 64  }
 0x125   : > { %504 = vsyncadd (%p665_p7), [#allocation4], 4294967232 }
 0x126 PF: > { %s17_s14 = sadd.s32 1, %s527_s14   ;;  %s718_s9 = smov %s511_s10 }
 0x127   : > { %p14_p10 = scmp.ge.s32.totalorder %s17_s14, 4   ;;  %s719_s10 = smov %s515_s11 }
 0x128   : > { %s720_s11 = smov %s600_s21  ;;  %s721_s12 = smov %s523_s13 }
 0x129   : > { %s722_s13 = smov %s724_s16  ;;  %16 = sbr.rel (!%p14_p10) target bundleno = 5 (0x5), region = 73 }
 0x130   :  { %283 = vsyncpa [#allocation3], 1 }
 0x131   :  { %285 = vsyncpa [#allocation3 + $0x1], 1 }
 0x132   :  { %286 = vsyncpa [#allocation4], 1 }
 0x133   :  { %288 = vsyncpa [#allocation4 + $0x1], 1 }

</bundles_post_ra>
